<compile_context>
chip_gen: v5e
topology: v5e:2x2
jax: 0.10.0
libtpu: 0.0.40
codegen_flags: <defaults>
</compile_context>

<pallas_src>
import functools
import math

import jax
import jax.numpy as jnp
from jax.experimental import pallas as pl
from jax.experimental.pallas import tpu as pltpu


def _decomp_kernel(w_ref, b_ref, x_ref, res_ref, mean_ref, *,
                   kernel_sizes, use_cumsum):
    # x_ref block: (L, Dt) -- batch dim squeezed out by the BlockSpec.
    x = x_ref[...].astype(jnp.float32)
    L, Dt = x.shape
    ks = tuple(kernel_sizes)
    M = len(ks)
    p_max = (max(ks) - 1) // 2
    Lp = L + 2 * p_max

    # ---- softmax stabilizer: mx = max_m (w_m * x + b_m).
    # Logits are NOT kept live; they are recomputed (1 mul + 1 add) right before the
    # exp that consumes them, removing ~2*M full (L, Dt) f32 buffers from VMEM.
    mx = x * w_ref[0] + b_ref[0]
    for m in range(1, M):
        mx = jnp.maximum(mx, x * w_ref[m] + b_ref[m])

    # ---- single replicate-padded buffer at the maximum half-width ----
    if p_max > 0:
        front = jnp.broadcast_to(x[0:1, :], (p_max, Dt))
        end = jnp.broadcast_to(x[L - 1:L, :], (p_max, Dt))
        padded = jnp.concatenate([front, x, end], axis=0)        # (Lp, Dt)
    else:
        padded = x

    denom = jnp.zeros((L, Dt), jnp.float32)   # sum_m exp_m
    acc = jnp.zeros((L, Dt), jnp.float32)     # sum_m exp_m * mean_m

    if use_cumsum and p_max > 0:
        # Hillis-Steele inclusive prefix sum along L: log2(Lp) shift+add steps; each
        # kernel's centered window sum is then a difference of two shifted slices.
        s = padded
        shift = 1
        while shift < Lp:
            shifted = jnp.concatenate(
                [jnp.zeros((shift, Dt), jnp.float32), s[:Lp - shift, :]], axis=0)
            s = s + shifted
            shift *= 2
        # Prepend a zero row so s0[j] = sum(padded[:j]); any inclusive window [a, b]
        # is s0[b+1] - s0[a] with no edge special case.
        s0 = jnp.concatenate([jnp.zeros((1, Dt), jnp.float32), s], axis=0)

        for m in range(M):
            k = ks[m]
            p = (k - 1) // 2
            win = (s0[p_max + p + 1:p_max + p + 1 + L, :]
                   - s0[p_max - p:p_max - p + L, :])
            e = jnp.exp(x * w_ref[m] + b_ref[m] - mx)
            denom = denom + e
            acc = acc + win * (e * (1.0 / float(k)))
    else:
        # Incremental shift-add windows (cheaper when p_max is small): kernel sizes
        # processed in ascending order share one running centered window sum.
        order = sorted(range(M), key=lambda m: ks[m])
        win = padded[p_max:p_max + L, :]       # running window sum (k = 1)
        prev_p = 0
        for m in order:
            k = ks[m]
            p = (k - 1) // 2
            for off in range(prev_p + 1, p + 1):
                win = win + padded[p_max - off:p_max - off + L, :]
                win = win + padded[p_max + off:p_max + off + L, :]
            prev_p = p
            e = jnp.exp(x * w_ref[m] + b_ref[m] - mx)
            denom = denom + e
            acc = acc + win * (e * (1.0 / float(k)))

    # Exact normalization. (The previous approx reciprocal cost ~1e-3 relative accuracy
    # and failed the residual check; the divide is cheap and the kernel is close to the
    # HBM roofline on v5e/v6e anyway.)
    mean = acc / denom
    mean_ref[...] = mean.astype(mean_ref.dtype)
    res_ref[...] = (x - mean).astype(res_ref.dtype)


def _pick_d_tile(d_pad, L, p_max, vmem_limit_bytes):
    """Largest multiple-of-128 divisor of d_pad whose estimated per-step f32 working
    set fits inside ~half the (generation-aware) VMEM limit."""
    lp = L + 2 * p_max + 1
    budget = max(vmem_limit_bytes // 2, 1 << 20)

    def est_bytes(dt):
        # ~10 live (lp, dt) f32 intermediates in the kernel plus double-buffered
        # (L, dt) blocks for one input and two outputs.
        return 4 * dt * (10 * lp + 6 * L)

    q = d_pad // 128
    for r in range(q, 0, -1):
        if q % r == 0 and est_bytes(128 * r) <= budget:
            return 128 * r
    return 128


def series_decomp_multi(x, weight, bias, kernel_sizes):
    """x: (B, L, D); weight: (M, 1); bias: (M,).  Returns (res, moving_mean)."""
    B, L, D = x.shape
    M = len(kernel_sizes)
    assert weight.shape == (M, 1) and bias.shape == (M,)
    for k in kernel_sizes:
        # Even k would change the output length under AvgPool1d(padding=0); the
        # PyTorch module only matches this decomposition for odd k.
        assert k % 2 == 1, "series_decomp_multi requires odd kernel sizes"

    kernel_sizes = tuple(int(k) for k in kernel_sizes)
    p_max = (max(kernel_sizes) - 1) // 2

    w_flat = weight.reshape(M).astype(jnp.float32)
    b_flat = bias.astype(jnp.float32)

    # Lane-dense channel padding: pad D to the next multiple of 128 so every output
    # store is an unmasked full-lane vst and the block size stays bounded.
    D_pad = -(-D // 128) * 128
    x_in = x if D_pad == D else jnp.pad(x, ((0, 0), (0, 0), (0, D_pad - D)))

    # Generation-aware VMEM budget (v7x: 64 MiB, v5e/v6e: 128 MiB).
    try:
        vmem_cap = int(getattr(pltpu.get_tpu_info(), "vmem_capacity_bytes", 64 << 20))
    except Exception:
        vmem_cap = 64 << 20
    vmem_limit = min(vmem_cap * 3 // 4, 96 << 20)

    Dt = _pick_d_tile(D_pad, L, p_max, vmem_limit)
    nD = D_pad // Dt

    # Trace-time choice of window-sum scheme (VALU ops / element, roughly).
    Lp = L + 2 * p_max
    cumsum_ops = 2 * max(1, math.ceil(math.log2(max(Lp, 2)))) + 2 * M
    shift_ops = 2 * p_max + M
    use_cumsum = (p_max > 0) and (cumsum_ops < shift_ops)

    kernel = functools.partial(_decomp_kernel,
                               kernel_sizes=kernel_sizes,
                               use_cumsum=use_cumsum)

    out_shape = (
        jax.ShapeDtypeStruct((B, L, D_pad), x.dtype),  # res
        jax.ShapeDtypeStruct((B, L, D_pad), x.dtype),  # moving_mean
    )

    smem_spec = pl.BlockSpec(memory_space=pltpu.MemorySpace.SMEM)
    xio_spec = pl.BlockSpec((None, L, Dt), lambda b, d: (b, 0, d))

    res, mean = pl.pallas_call(
        kernel,
        grid=(B, nD),
        in_specs=[smem_spec, smem_spec, xio_spec],
        out_specs=(xio_spec, xio_spec),
        out_shape=out_shape,
        compiler_params=pltpu.CompilerParams(
            dimension_semantics=("parallel", "parallel"),
            vmem_limit_bytes=int(vmem_limit)),
    )(w_flat, b_flat, x_in)

    if D_pad != D:
        res = res[..., :D]
        mean = mean[..., :D]
    return res, mean


def _reference(x, weight, bias, kernel_sizes):
    """Pure-JAX reference mirroring the PyTorch forward."""
    B, L, D = x.shape
    means = []
    for k in kernel_sizes:
        p = (k - 1) // 2
        front = jnp.repeat(x[:, 0:1, :], p, axis=1)
        end = jnp.repeat(x[:, -1:, :], p, axis=1)
        xp = jnp.concatenate([front, x, end], axis=1)
        mm = jnp.mean(jnp.stack([xp[:, j:j + L, :] for j in range(k)], 0), 0)
        means.append(mm)
    mm = jnp.stack(means, axis=-1)                                   # (B,L,D,M)
    logits = x[..., None] * weight.reshape(1, 1, 1, -1) + bias.reshape(1, 1, 1, -1)
    sw = jax.nn.softmax(logits, axis=-1)
    mean = jnp.sum(mm * sw, axis=-1)
    return x - mean, mean


if __name__ == "__main__":
    key = jax.random.PRNGKey(0)

    # Two small configs: the first exercises the shift-add path and the D%128
    # lane-padding fallback; the second exercises the cumsum-difference path.
    configs = [
        (2, 16, 32, (3, 7, 11)),
        (2, 32, 128, (9, 25, 49)),
    ]

    for idx, (B, L, D, kernel_sizes) in enumerate(configs):
        kx, kw, kb, key = jax.random.split(key, 4)
        M = len(kernel_sizes)
        x = jax.random.normal(kx, (B, L, D), dtype=jnp.float32)
        # Deterministic Linear(1, M) parameters (synthetic init, no checkpoint).
        weight = jax.random.normal(kw, (M, 1), dtype=jnp.float32) * 0.5
        bias = jax.random.normal(kb, (M,), dtype=jnp.float32) * 0.1

        res, mean = series_decomp_multi(x, weight, bias, kernel_sizes)
        jax.block_until_ready((res, mean))

        res_ref, mean_ref = _reference(x, weight, bias, kernel_sizes)
        assert jnp.allclose(mean, mean_ref, atol=1e-4, rtol=1e-4), f"mean mismatch cfg {idx}"
        assert jnp.allclose(res, res_ref, atol=1e-4, rtol=1e-4), f"res mismatch cfg {idx}"
        # Structural self-consistency (res == x - mean) holds tightly.
        assert jnp.allclose(res, x - mean, atol=1e-6, rtol=1e-6), f"res != x - mean cfg {idx}"

    print("KERNEL_OK")
</pallas_src>

<mosaic_0001>
module attributes {stable_mosaic.version = 11 : i64} {
  func.func @_decomp_kernel(%arg0: i32, %arg1: i32, %arg2: memref<3xf32, #tpu.memory_space<smem>>, %arg3: memref<3xf32, #tpu.memory_space<smem>>, %arg4: memref<1x16x128xf32, #tpu.memory_space<vmem>>, %arg5: memref<1x16x128xf32, #tpu.memory_space<vmem>>, %arg6: memref<1x16x128xf32, #tpu.memory_space<vmem>>) attributes {dimension_semantics = [#tpu.dimension_semantics<parallel>, #tpu.dimension_semantics<parallel>], iteration_bounds = array<i64: 2, 1>, scalar_prefetch = 0 : i64, scratch_operands = 0 : i64, tpu.core_type = #tpu.core_type<tc>, window_params = [{transform_indices = @transform_0, window_bounds = array<i64: 3>}, {transform_indices = @transform_1, window_bounds = array<i64: 3>}, {transform_indices = @transform_2, window_bounds = array<i64: 1, 16, 128>}, {transform_indices = @transform_3, window_bounds = array<i64: 1, 16, 128>}, {transform_indices = @transform_4, window_bounds = array<i64: 1, 16, 128>}]} {
    %c0 = arith.constant 0 : index
    %c0_0 = arith.constant 0 : index
    %c0_1 = arith.constant 0 : index
    %0 = vector.load %arg4[%c0, %c0_0, %c0_1] : memref<1x16x128xf32, #tpu.memory_space<vmem>>, vector<1x16x128xf32>
    %1 = vector.shape_cast %0 : vector<1x16x128xf32> to vector<16x128xf32>
    %c0_2 = arith.constant 0 : index
    %2 = memref.load %arg2[%c0_2] : memref<3xf32, #tpu.memory_space<smem>>
    %3 = vector.broadcast %2 : f32 to vector<16x128xf32>
    %4 = arith.mulf %1, %3 : vector<16x128xf32>
    %c0_3 = arith.constant 0 : index
    %5 = memref.load %arg3[%c0_3] : memref<3xf32, #tpu.memory_space<smem>>
    %6 = vector.broadcast %5 : f32 to vector<16x128xf32>
    %7 = arith.addf %4, %6 : vector<16x128xf32>
    %c1 = arith.constant 1 : index
    %8 = memref.load %arg2[%c1] : memref<3xf32, #tpu.memory_space<smem>>
    %9 = vector.broadcast %8 : f32 to vector<16x128xf32>
    %10 = arith.mulf %1, %9 : vector<16x128xf32>
    %c1_4 = arith.constant 1 : index
    %11 = memref.load %arg3[%c1_4] : memref<3xf32, #tpu.memory_space<smem>>
    %12 = vector.broadcast %11 : f32 to vector<16x128xf32>
    %13 = arith.addf %10, %12 : vector<16x128xf32>
    %14 = arith.maximumf %7, %13 : vector<16x128xf32>
    %c2 = arith.constant 2 : index
    %15 = memref.load %arg2[%c2] : memref<3xf32, #tpu.memory_space<smem>>
    %16 = vector.broadcast %15 : f32 to vector<16x128xf32>
    %17 = arith.mulf %1, %16 : vector<16x128xf32>
    %c2_5 = arith.constant 2 : index
    %18 = memref.load %arg3[%c2_5] : memref<3xf32, #tpu.memory_space<smem>>
    %19 = vector.broadcast %18 : f32 to vector<16x128xf32>
    %20 = arith.addf %17, %19 : vector<16x128xf32>
    %21 = arith.maximumf %14, %20 : vector<16x128xf32>
    %22 = vector.extract_strided_slice %1 {offsets = [0, 0], sizes = [1, 128], strides = [1, 1]} : vector<16x128xf32> to vector<1x128xf32>
    %23 = vector.shape_cast %22 : vector<1x128xf32> to vector<1x128xf32>
    %24 = vector.broadcast %23 : vector<1x128xf32> to vector<5x128xf32>
    %25 = vector.extract_strided_slice %1 {offsets = [15, 0], sizes = [1, 128], strides = [1, 1]} : vector<16x128xf32> to vector<1x128xf32>
    %26 = vector.shape_cast %25 : vector<1x128xf32> to vector<1x128xf32>
    %27 = vector.broadcast %26 : vector<1x128xf32> to vector<5x128xf32>
    %28 = tpu.concatenate %24, %1, %27 in 0 : vector<5x128xf32>, vector<16x128xf32>, vector<5x128xf32> -> vector<26x128xf32>
    %cst = arith.constant 0.000000e+00 : f32
    %29 = vector.broadcast %cst : f32 to vector<16x128xf32>
    %cst_6 = arith.constant 0.000000e+00 : f32
    %30 = vector.broadcast %cst_6 : f32 to vector<16x128xf32>
    %31 = vector.extract_strided_slice %28 {offsets = [5, 0], sizes = [16, 128], strides = [1, 1]} : vector<26x128xf32> to vector<16x128xf32>
    %32 = vector.extract_strided_slice %28 {offsets = [4, 0], sizes = [16, 128], strides = [1, 1]} : vector<26x128xf32> to vector<16x128xf32>
    %33 = arith.addf %31, %32 : vector<16x128xf32>
    %34 = vector.extract_strided_slice %28 {offsets = [6, 0], sizes = [16, 128], strides = [1, 1]} : vector<26x128xf32> to vector<16x128xf32>
    %35 = arith.addf %33, %34 : vector<16x128xf32>
    %c0_7 = arith.constant 0 : index
    %36 = memref.load %arg2[%c0_7] : memref<3xf32, #tpu.memory_space<smem>>
    %37 = vector.broadcast %36 : f32 to vector<16x128xf32>
    %38 = arith.mulf %1, %37 : vector<16x128xf32>
    %c0_8 = arith.constant 0 : index
    %39 = memref.load %arg3[%c0_8] : memref<3xf32, #tpu.memory_space<smem>>
    %40 = vector.broadcast %39 : f32 to vector<16x128xf32>
    %41 = arith.addf %38, %40 : vector<16x128xf32>
    %42 = arith.subf %41, %21 : vector<16x128xf32>
    %43 = math.exp %42 : vector<16x128xf32>
    %44 = arith.addf %29, %43 : vector<16x128xf32>
    %cst_9 = arith.constant 0.333333343 : f32
    %45 = vector.broadcast %cst_9 : f32 to vector<16x128xf32>
    %46 = arith.mulf %43, %45 : vector<16x128xf32>
    %47 = arith.mulf %35, %46 : vector<16x128xf32>
    %48 = arith.addf %30, %47 : vector<16x128xf32>
    %49 = vector.extract_strided_slice %28 {offsets = [3, 0], sizes = [16, 128], strides = [1, 1]} : vector<26x128xf32> to vector<16x128xf32>
    %50 = arith.addf %35, %49 : vector<16x128xf32>
    %51 = vector.extract_strided_slice %28 {offsets = [7, 0], sizes = [16, 128], strides = [1, 1]} : vector<26x128xf32> to vector<16x128xf32>
    %52 = arith.addf %50, %51 : vector<16x128xf32>
    %53 = vector.extract_strided_slice %28 {offsets = [2, 0], sizes = [16, 128], strides = [1, 1]} : vector<26x128xf32> to vector<16x128xf32>
    %54 = arith.addf %52, %53 : vector<16x128xf32>
    %55 = vector.extract_strided_slice %28 {offsets = [8, 0], sizes = [16, 128], strides = [1, 1]} : vector<26x128xf32> to vector<16x128xf32>
    %56 = arith.addf %54, %55 : vector<16x128xf32>
    %c1_10 = arith.constant 1 : index
    %57 = memref.load %arg2[%c1_10] : memref<3xf32, #tpu.memory_space<smem>>
    %58 = vector.broadcast %57 : f32 to vector<16x128xf32>
    %59 = arith.mulf %1, %58 : vector<16x128xf32>
    %c1_11 = arith.constant 1 : index
    %60 = memref.load %arg3[%c1_11] : memref<3xf32, #tpu.memory_space<smem>>
    %61 = vector.broadcast %60 : f32 to vector<16x128xf32>
    %62 = arith.addf %59, %61 : vector<16x128xf32>
    %63 = arith.subf %62, %21 : vector<16x128xf32>
    %64 = math.exp %63 : vector<16x128xf32>
    %65 = arith.addf %44, %64 : vector<16x128xf32>
    %cst_12 = arith.constant 0.142857149 : f32
    %66 = vector.broadcast %cst_12 : f32 to vector<16x128xf32>
    %67 = arith.mulf %64, %66 : vector<16x128xf32>
    %68 = arith.mulf %56, %67 : vector<16x128xf32>
    %69 = arith.addf %48, %68 : vector<16x128xf32>
    %70 = vector.extract_strided_slice %28 {offsets = [1, 0], sizes = [16, 128], strides = [1, 1]} : vector<26x128xf32> to vector<16x128xf32>
    %71 = arith.addf %56, %70 : vector<16x128xf32>
    %72 = vector.extract_strided_slice %28 {offsets = [9, 0], sizes = [16, 128], strides = [1, 1]} : vector<26x128xf32> to vector<16x128xf32>
    %73 = arith.addf %71, %72 : vector<16x128xf32>
    %74 = vector.extract_strided_slice %28 {offsets = [0, 0], sizes = [16, 128], strides = [1, 1]} : vector<26x128xf32> to vector<16x128xf32>
    %75 = arith.addf %73, %74 : vector<16x128xf32>
    %76 = vector.extract_strided_slice %28 {offsets = [10, 0], sizes = [16, 128], strides = [1, 1]} : vector<26x128xf32> to vector<16x128xf32>
    %77 = arith.addf %75, %76 : vector<16x128xf32>
    %c2_13 = arith.constant 2 : index
    %78 = memref.load %arg2[%c2_13] : memref<3xf32, #tpu.memory_space<smem>>
    %79 = vector.broadcast %78 : f32 to vector<16x128xf32>
    %80 = arith.mulf %1, %79 : vector<16x128xf32>
    %c2_14 = arith.constant 2 : index
    %81 = memref.load %arg3[%c2_14] : memref<3xf32, #tpu.memory_space<smem>>
    %82 = vector.broadcast %81 : f32 to vector<16x128xf32>
    %83 = arith.addf %80, %82 : vector<16x128xf32>
    %84 = arith.subf %83, %21 : vector<16x128xf32>
    %85 = math.exp %84 : vector<16x128xf32>
    %86 = arith.addf %65, %85 : vector<16x128xf32>
    %cst_15 = arith.constant 0.0909090936 : f32
    %87 = vector.broadcast %cst_15 : f32 to vector<16x128xf32>
    %88 = arith.mulf %85, %87 : vector<16x128xf32>
    %89 = arith.mulf %77, %88 : vector<16x128xf32>
    %90 = arith.addf %69, %89 : vector<16x128xf32>
    %91 = arith.divf %90, %86 : vector<16x128xf32>
    %c0_16 = arith.constant 0 : index
    %c0_17 = arith.constant 0 : index
    %c0_18 = arith.constant 0 : index
    %92 = vector.load %arg6[%c0_16, %c0_17, %c0_18] : memref<1x16x128xf32, #tpu.memory_space<vmem>>, vector<1x16x128xf32>
    %93 = vector.shape_cast %92 : vector<1x16x128xf32> to vector<16x128xf32>
    %94 = vector.shape_cast %91 : vector<16x128xf32> to vector<1x16x128xf32>
    tpu.vector_store %arg6[%c0_16, %c0_17, %c0_18], %94 {strides = array<i32>} : memref<1x16x128xf32, #tpu.memory_space<vmem>>, vector<1x16x128xf32>,
    %95 = arith.subf %1, %91 : vector<16x128xf32>
    %c0_19 = arith.constant 0 : index
    %c0_20 = arith.constant 0 : index
    %c0_21 = arith.constant 0 : index
    %96 = vector.load %arg5[%c0_19, %c0_20, %c0_21] : memref<1x16x128xf32, #tpu.memory_space<vmem>>, vector<1x16x128xf32>
    %97 = vector.shape_cast %96 : vector<1x16x128xf32> to vector<16x128xf32>
    %98 = vector.shape_cast %95 : vector<16x128xf32> to vector<1x16x128xf32>
    tpu.vector_store %arg5[%c0_19, %c0_20, %c0_21], %98 {strides = array<i32>} : memref<1x16x128xf32, #tpu.memory_space<vmem>>, vector<1x16x128xf32>,
    return
  }
  func.func @transform_0(%arg0: i32, %arg1: i32) -> i32 {
    %c0_i32 = arith.constant 0 : i32
    %c0_i32_0 = arith.constant 0 : i32
    return %c0_i32 : i32
  }
  func.func @transform_1(%arg0: i32, %arg1: i32) -> i32 {
    %c0_i32 = arith.constant 0 : i32
    %c0_i32_0 = arith.constant 0 : i32
    return %c0_i32 : i32
  }
  func.func @transform_2(%arg0: i32, %arg1: i32) -> (i32, i32, i32) {
    %c0_i32 = arith.constant 0 : i32
    %c0_i32_0 = arith.constant 0 : i32
    return %arg0, %c0_i32, %arg1 : i32, i32, i32
  }
  func.func @transform_3(%arg0: i32, %arg1: i32) -> (i32, i32, i32) {
    %c0_i32 = arith.constant 0 : i32
    %c0_i32_0 = arith.constant 0 : i32
    return %arg0, %c0_i32, %arg1 : i32, i32, i32
  }
  func.func @transform_4(%arg0: i32, %arg1: i32) -> (i32, i32, i32) {
    %c0_i32 = arith.constant 0 : i32
    %c0_i32_0 = arith.constant 0 : i32
    return %arg0, %c0_i32, %arg1 : i32, i32, i32
  }
}

</mosaic_0001>

<bundles_post_ra>
// kernel: tpu_custom_call.1
= control target key start
LH: loop header
LB: loop body
LE: loop exit
PB: predicated region body
PF: predicated region fallthrough
CT: control target
= control target key end

     0   :  { %s1435_s0 = inlined_call_operand.hbm [shape: f32[3], index: 0, kind: input, shape index: {}]   ;;  %s1436_s1 = inlined_call_operand.hbm [shape: f32[3], index: 1, kind: input, shape index: {}]   ;;  %s1437_s2 = inlined_call_operand.hbm [shape: f32[2,16,128], index: 2, kind: input, shape index: {}]   ;;  %s1438_s3 = inlined_call_operand.hbm [shape: f32[2,16,128], index: 3, kind: output, shape index: {0}]   ;;  %s1439_s4 = inlined_call_operand.hbm [shape: f32[2,16,128], index: 4, kind: output, shape index: {1}]  }
   0x1   :  { %1440 = sst [smem:[#allocation17_spill]] %s1435_s0 }
   0x2   :  { %1441 = sst [smem:[#allocation18_spill]] %s1436_s1 }
   0x3   :  { %10 = vsyncpa [#allocation5], 0 }
   0x4   :  { %11 = vsyncpa [#allocation7], 0 }
   0x5   :  { %12 = vsyncpa [#allocation3], 0 }
   0x6   :  { %14 = vsyncpa [#allocation3 + $0x1], 0 }
   0x7   :  { %15 = vsyncpa [#allocation4], 0 }
   0x8   :  { %17 = vsyncpa [#allocation4 + $0x1], 0 }
   0x9   :  { %18 = vsyncpa [#allocation11], 0 }
   0xa   :  { %20 = vsyncpa [#allocation11 + $0x1], 0  ;;  %s1102_s15 = smov 0   ;;  %s1104_s16 = smov 0  }
   0xb   :  { %s1106_s17 = smov 0   ;;  %s1108_s18 = smov 0  }
   0xc   :  { %s1110_s19 = smov 0   ;;  %s1112_s20 = smov 0  }
   0xd LB: > { %s747_s21 = sadd.s32 4294967295, %s1069_s20   ;;  %s748_s22 = sadd.s32 4294967294, %s1069_s20   ;;  %s1069_s20 = sphi %s1112_s20, %s26_s20   ;;  %s1065_s19 = sphi %s1110_s19, %s1459_s19   ;;  %s1061_s18 = sphi %s1108_s18, %s1458_s18   ;;  %s1057_s17 = sphi %s1106_s17, %s1457_s17   ;;  %s1053_s16 = sphi %s1104_s16, %s1456_s16   ;;  %s1049_s15 = sphi %s1102_s15, %s1455_s15  }
   0xe   : > { %s89_s23 = sadd.s32 1, %s1057_s17  ;;  %p96_p0 = scmp.ne.s32.totalorder %s1057_s17, %s1053_s16 }
   0xf   : > { %p97_p1 = scmp.eq.s32.totalorder %s1069_s20, 0  ;;  %p102_p2 = scmp.ne.s32.totalorder %s1053_s16, %s1049_s15 }
  0x10   : > { %p1140_p3 = scmp.eq.s32.totalorder %s747_s21, 0  ;;  %p128_p4 = scmp.eq.s32.totalorder %s747_s21, 1 }
  0x11   : > { %p1144_p5 = por %p97_p1, %p96_p0  ;;  %p134_p6 = scmp.eq.s32.totalorder %s748_s22, 1 }
  0x12   : > { %p1150_p7 = por %p1140_p3, %p102_p2  ;;  %p1154_p8 = por %p128_p4, %p96_p0 }
  0x13   : > { %p1158_p9 = por %p134_p6, %p102_p2  ;;  %p749_p10 = scmp.ge.s32.totalorder %s1069_s20, 1 }
  0x14   : > { %p169_p11 = scmp.lt.s32.totalorder %s1069_s20, 3  ;;  %s1447_s0 = sld [smem:[#allocation17_spill]] }
  0x15   : > { %p752_p13 = scmp.ge.s32.totalorder %s1069_s20, 2  ;;  %p811_p0 = scmp.lt.s32.totalorder %s1069_s20, 2 }
  0x16   : > { %p1167_p12 = pnand %p749_p10, %p169_p11  ;;  %s1449_s1 = sld [smem:[#allocation18_spill]] }
  0x17   : > { %p1180_p2 = pnand %p811_p0, %p1144_p5  ;;  %s1071_s11 = smov [#allocation2]  }
  0x18   : > { %p791_p1 = pneg %p1167_p12  ;;  %s1072_s12 = smov [#allocation6]  }
  0x19   : > { %s38_s13 = sadd.s32 1, %s1065_s19  ;;  %s202_s14 = sand.u32 1, %s1057_s17  }
  0x1a   : > { %s181_s5 = sshll.u32 %s1447_s0, 4  ;;  %p792_p4 = pnand %p791_p1, %p1140_p3  ;;  %s182_s5 = int_to_ptr.hbm [resolvable:$true] %s181_s5 }
  0x1b   : > { %p40_p6 = scmp.ge.s32.totalorder %s38_s13, 2  ;;  %s753_s21 = sshll.u32 %s202_s14, 4 }
  0x1c   : > { %s191_s9 = sshll.u32 %s1449_s1, 4  ;;  %s774_s22 = sshll.u32 %s1065_s19, 4  ;;  %s192_s9 = int_to_ptr.hbm [resolvable:$true] %s191_s9 }
  0x1d   : > { %794 = dma.hbm_to_smem (!%p792_p4), %s182_s5, 16, %s1071_s11, [#allocation5]  }
  0x1e   : > { %797 = dma.hbm_to_smem (!%p792_p4), %s192_s9, 16, %s1072_s12, [#allocation7]  }
  0x1f   : > { %s1461_s13 = smov (%p40_p6, %s38_s13), 0  ;;  %s212_s30 = scalar_lea.hbm %s1437_s2, %s774_s22 }
  0x20   : > { %s84_s7 = ssub.s32 %s1065_s19, %s1461_s13  ;;  %s213_s8 = sshll.u32 %s212_s30, 4  ;;  %s214_s8 = int_to_ptr.hbm [resolvable:$true] %s213_s8 }
  0x21   : > { %p87_p5 = scmp.eq.s32.totalorder %s84_s7, 0  ;;  %s206_s5 = scalar_lea.vmem [#allocation8], %s753_s21 }
  0x22   : > { %s215_s11 = sshll.u32 %s206_s5, 4  ;;  %s203_s12 = scalar_lea.sflag [#allocation3], %s202_s14  ;;  %s216_s11 = int_to_ptr.vmem [resolvable:$true] %s215_s11 }
  0x23   : > { %s1199_s9 = scalar_select %p87_p5, %s1057_s17, %s89_s23  }
  0x24   : > { %s1073_s0 = smov 128   ;;  %s1074_s1 = smov 8  }
  0x25   : > { %801 = dma.hbm_to_vmem [thread:$0]  (!%p1180_p2), %s214_s8, 256, %s216_s11, %s203_s12, %s1073_s0, %s1073_s0, %s1074_s1  }
  0x26   : > { %227 = sbr.rel (%p1167_p12) target bundleno = 130 (0x82), region = 32 }
  0x2b   : > { %1028 = dma.done.wait (%p1140_p3), [#allocation5], 16  }
  0x2c   : > { %1030 = vsyncadd (%p1140_p3), [#allocation5], 4294967280 }
  0x2d   : > { %1032 = dma.done.wait (%p1140_p3), [#allocation7], 16  }
  0x2e   : > { %1034 = vsyncadd (%p1140_p3), [#allocation7], 4294967280  ;;  %s1214_s23 = sand.u32 1, %s1053_s16  }
  0x2f   : > { %s1217_s0 = sshll.u32 %s1214_s23, 4  ;;  %s240_s1 = scalar_lea.sflag [#allocation3], %s1214_s23 }
  0x30   : > { %s243_s6 = scalar_lea.vmem [#allocation8], %s1217_s0 }
  0x31   : > { %1036 = dma.done.wait (%p1150_p7), %s240_s1, 256  }
  0x32   : > { %1038 = vsyncadd (%p1150_p7), %s240_s1, 4294967040 }
  0x33   : > { %249 = sfence }
  0x34   : > { %v1225_v0 = vld [vmem:[%s243_s6] sm:$0xff]  ;;  %v1227_v1 = vld [vmem:[%s243_s6 + $0x8] sm:$0xff]  ;;  %s277_s24 = sld [smem:[#allocation2]]  ;;  %vm309_vm0 = vcmask 1044480   ;;  %vm333_vm1 = vcmask 1046528   ;;  %vm381_vm2 = vcmask 1045504  }
  0x35   : > { %s1229_s10 = sld [smem:[#allocation6]]  ;;  %v305_v2 = vperm.slane %v1225_v0, 0  ;;  %v310_v3 = vrot.slane %v1225_v0, 3  ;;  %v311_v4 = vrot.slane %v1227_v1, 3  ;;  %v1254_v12 = vperm.slane %v1227_v1, 7  ;;  %s775_s25 = sshll.u32 %s1061_s18, 4 }
  0x36   : > { %s1234_s14 = sld [smem:[#allocation2 + $0x1]]  ;;  %vm321_vm3 = vcmask 1040384   ;;  %vm369_vm4 = vcmask 1041408   ;;  %vm393_vm5 = vcmask 1042432   ;;  %vm438_vm6 = vcmask 1043456   ;;  %s274_s29 = scalar_lea.vmem [#allocation10], %s1217_s0 }
  0x37   : > { %s1236_s21 = sld [smem:[#allocation6 + $0x1]]  ;;  %v1239_v5 = vsel %vm309_vm0, %v310_v3, %v311_v4  ;;  %v1242_v6 = vsel %vm309_vm0, %v305_v2, %v310_v3  ;;  %v1283_v39 = vsel %vm309_vm0, %v311_v4, %v1254_v12  ;;  %s602_s30 = sshll.u32 %s274_s29, 4  ;;  %s1374_s30 = int_to_ptr.vmem [resolvable:$true] %s602_s30 }
  0x38   : > { %s1244_s26 = sld [smem:[#allocation2 + $0x2]]  ;;  %v322_v7 = vrot.slane %v1242_v6, 7  ;;  %v334_v8 = vrot.slane %v1242_v6, 1  ;;  %v335_v9 = vrot.slane %v1239_v5, 1  ;;  %v382_v10 = vrot.slane %v1242_v6, 2  ;;  %s601_s18 = scalar_lea.hbm %s1439_s4, %s775_s25 }
  0x39   : > { %s1249_s22 = sld [smem:[#allocation6 + $0x2]]  ;;  %v383_v11 = vrot.slane %v1239_v5, 2  ;;  %v370_v16 = vrot.slane %v1242_v6, 6  ;;  %v394_v20 = vrot.slane %v1242_v6, 5  ;;  %v1270_v24 = vrot.slane %v1239_v5, 3  ;;  %s604_s5 = sshll.u32 %s601_s18, 4  ;;  %s605_s5 = int_to_ptr.hbm [resolvable:$true] %s604_s5 }
  0x3a   : > { %v278_v13 = vstv %s277_s24  ;;  %v330_v14 = vadd.f32 %v322_v7, %v1242_v6  ;;  %v336_v15 = vsel %vm333_vm1, %v334_v8, %v335_v9  ;;  %v439_v32 = vrot.slane %v1242_v6, 4  ;;  %s1381_s1 = scalar_lea.hbm %s1438_s3, %s775_s25  ;;  %s267_s6 = scalar_lea.vmem [#allocation9], %s1217_s0 }
  0x3b   : > { %v279_v17 = vmul.f32 %v278_v13, %v1225_v0  ;;  %v280_v18 = vmul.f32 %v278_v13, %v1227_v1  ;;  %v282_v19 = vstv %s1229_s10  ;;  %v384_v23 = vsel %vm381_vm2, %v382_v10, %v383_v11  ;;  %s584_s24 = sshll.u32 %s267_s6, 4  ;;  %s586_s10 = sshll.u32 %s1381_s1, 4  ;;  %s585_s24 = int_to_ptr.vmem [resolvable:$true] %s584_s24  ;;  %s587_s10 = int_to_ptr.hbm [resolvable:$true] %s586_s10 }
  0x3c   : > { %v286_v21 = vstv %s1234_s14  ;;  %v1264_v22 = vadd.f32 %v336_v15, %v330_v14  ;;  %v323_v40 = vrot.slane %v1239_v5, 7  ;;  %v325_v47 = vrot.slane %v1283_v39, 7  ;;  %s571_s14 = scalar_lea.sflag [#allocation11], %s1214_s23  ;;  %s967_s7 = scalar_lea.hbm %s1439_s4, 32 }
  0x3d   : > { %v283_v25 = vadd.f32 %v282_v19, %v279_v17  ;;  %v284_v26 = vadd.f32 %v282_v19, %v280_v18  ;;  %v287_v27 = vmul.f32 %v286_v21, %v1225_v0  ;;  %v288_v28 = vmul.f32 %v286_v21, %v1227_v1 }
  0x3e   : > { %v290_v29 = vstv %s1236_s21  ;;  %v296_v30 = vstv %s1244_s26  ;;  %v378_v31 = vadd.f32 %v370_v16, %v1264_v22  ;;  %v324_v46 = vsel %vm321_vm3, %v322_v7, %v323_v40  ;;  %s961_s21 = sshra.s32 %s605_s5, 4  ;;  %s962_s21 = int_to_ptr.hbm [resolvable:$true] %s961_s21 }
  0x3f   : > { %v291_v33 = vadd.f32 %v290_v29, %v287_v27  ;;  %v292_v34 = vadd.f32 %v290_v29, %v288_v28  ;;  %v297_v35 = vmul.f32 %v296_v30, %v1225_v0  ;;  %v298_v36 = vmul.f32 %v296_v30, %v1227_v1  ;;  %s963_s26 = scalar_lea.hbm %s962_s21, 16  ;;  %p968_p11 = scmp.lt.s32.totalorder %s962_s21, %s1439_s4 }
  0x40   : > { %v300_v37 = vstv %s1249_s22  ;;  %v390_v38 = vadd.f32 %v384_v23, %v378_v31  ;;  %v337_v48 = vrot.slane %v1283_v39, 1  ;;  %v331_v51 = vadd.f32 %v324_v46, %v1239_v5  ;;  %p964_p3 = scmp.ne.s32.totalorder %s962_s21, %s963_s26  ;;  %p969_p12 = scmp.lt.s32.totalorder %s967_s7, %s963_s26 }
  0x41   : > { %v293_v41 = vmax.f32 %v283_v25, %v291_v33  ;;  %v294_v42 = vmax.f32 %v284_v26, %v292_v34  ;;  %v301_v43 = vadd.f32 %v300_v37, %v297_v35  ;;  %v302_v44 = vadd.f32 %v300_v37, %v298_v36 }
  0x42   : > { %v402_v45 = vadd.f32 %v394_v20, %v390_v38  ;;  %v371_v52 = vrot.slane %v1239_v5, 6  ;;  %v326_v54 = vsel %vm321_vm3, %v323_v40, %v325_v47  ;;  %v338_v55 = vsel %vm333_vm1, %v335_v9, %v337_v48  ;;  %p965_p7 = pnand %p964_p3, %p1154_p8  ;;  %p970_p0 = por %p969_p12, %p968_p11 }
  0x43   : > { %v303_v49 = vmax.f32 %v293_v41, %v301_v43  ;;  %v304_v50 = vmax.f32 %v294_v42, %v302_v44  ;;  %v373_v56 = vrot.slane %v1283_v39, 6  ;;  %v332_v60 = vadd.f32 %v326_v54, %v1283_v39 }
  0x44   : > { %v1292_v53 = vadd.f32 %v1270_v24, %v402_v45  ;;  %v395_v61 = vrot.slane %v1239_v5, 5  ;;  %v1299_v62 = vadd.f32 %v338_v55, %v331_v51  ;;  %v372_v2 = vsel %vm369_vm4, %v370_v16, %v371_v52  ;;  %p966_p10 = pneg %p965_p7 }
  0x45   : > { %v345_v57 = vsub.f32 %v283_v25, %v303_v49  ;;  %v414_v58 = vsub.f32 %v291_v33, %v303_v49  ;;  %v471_v59 = vsub.f32 %v301_v43, %v303_v49  ;;  %v346_v63 = vsub.f32 %v284_v26, %v304_v50 }
  0x46   : > { %v1302_v8 = vadd.f32 %v337_v48, %v332_v60  ;;  %v447_v9 = vadd.f32 %v439_v32, %v1292_v53  ;;  %v374_v10 = vsel %vm369_vm4, %v371_v52, %v373_v56  ;;  %v379_v13 = vadd.f32 %v372_v2, %v1299_v62  ;;  %p971_p1 = pnand %p970_p0, %p966_p10 }
  0x47   : > { %v347_v3 = vmul.f32 1.442695, %v345_v57  ;;  %v416_v4 = vmul.f32 1.442695, %v414_v58  ;;  %v473_v7 = vmul.f32 1.442695, %v471_v59  ;;  %v396_v17 = vsel %vm393_vm5, %v394_v20, %v395_v61 }
  0x48   : > { %v380_v14 = vadd.f32 %v374_v10, %v1302_v8  ;;  %v385_v15 = vrot.slane %v1283_v39, 2  ;;  %v349_v16 = vmul.f32 1.442695, %v346_v63  ;;  %v397_v18 = vrot.slane %v1283_v39, 5 }
  0x49   : > { %869 = vpow2.f32 %v347_v3  ;;  %v406_v23 = vrot.slane %v1283_v39, 3  ;;  %v440_v25 = vrot.slane %v1239_v5, 4  ;;  %v415_v28 = vsub.f32 %v292_v34, %v304_v50 }
  0x4a   : > { %871 = vpow2.f32 %v416_v4  ;;  %v386_v19 = vsel %vm381_vm2, %v383_v11, %v385_v15  ;;  %v392_v21 = vadd.f32 %v385_v15, %v380_v14  ;;  %v1321_v27 = vsel %vm393_vm5, %v395_v61, %v397_v18 }
  0x4b   : > { %873 = vpow2.f32 %v473_v7  ;;  %v391_v26 = vadd.f32 %v386_v19, %v379_v13  ;;  %v407_v20 = vsel %vm309_vm0, %v1270_v24, %v406_v23  ;;  %v454_v29 = vadd.f32 %v447_v9, %v440_v25 }
  0x4c   : > { %v457_v30 = vrot.slane %v1242_v6, 3  ;;  %875 = vpow2.f32 %v349_v16  ;;  %v404_v33 = vadd.f32 %v1321_v27, %v392_v21  ;;  %v418_v35 = vmul.f32 1.442695, %v415_v28 }
  0x4d   : > { %v403_v11 = vadd.f32 %v396_v17, %v391_v26  ;;  %v472_v5 = vsub.f32 %v302_v44, %v304_v50  ;;  %v442_v40 = vrot.slane %v1283_v39, 4  ;;  %v441_v45 = vsel %vm438_vm6, %v439_v32, %v440_v25 }
  0x4e   : > { %877 = vpow2.f32 %v418_v35  ;;  %v461_v46 = vadd.f32 %v457_v30, %v454_v29  ;;  %v413_v48 = vadd.f32 %v406_v23, %v404_v33  ;;  %v450_v52 = vrot.slane %v1254_v12, 4 }
  0x4f   : > { %v870_v31 = vpop.eup %869  ;;  %v412_v38 = vadd.f32 %v407_v20, %v403_v11  ;;  %v475_v34 = vmul.f32 1.442695, %v472_v5  ;;  %v443_v51 = vsel %vm438_vm6, %v440_v25, %v442_v40  ;;  %v464_v32 = vrot.slane %v1254_v12, 5 }
  0x50   : > { %v872_v36 = vpop.eup %871  ;;  %v353_v37 = vmul.f32 0.33333334, %v870_v31  ;;  %v468_v59 = vadd.f32 %v461_v46, %v395_v61  ;;  %v449_v6 = vadd.f32 %v443_v51, %v413_v48  ;;  %v451_v3 = vsel %vm438_vm6, %v442_v40, %v450_v52 }
  0x51   : > { %v874_v41 = vpop.eup %873  ;;  %v420_v42 = vadd.f32 %v872_v36, %v870_v31  ;;  %v422_v43 = vmul.f32 0.14285715, %v872_v36  ;;  %879 = vpow2.f32 %v475_v34  ;;  %v448_v57 = vadd.f32 %v441_v45, %v412_v38 }
  0x52   : > { %v876_v49 = vpop.eup %875  ;;  %v357_v44 = vrot.slane %v353_v37, 3  ;;  %v479_v50 = vmul.f32 0.09090909, %v874_v41  ;;  %v458_v61 = vsel %vm309_vm0, %v457_v30, %v1270_v24  ;;  %v456_v17 = vadd.f32 %v451_v3, %v449_v6 }
  0x53   : > { %v477_v47 = vadd.f32 %v874_v41, %v420_v42  ;;  %v426_v54 = vrot.slane %v422_v43, 3  ;;  %v354_v56 = vmul.f32 0.33333334, %v876_v49  ;;  %v455_v13 = vadd.f32 %v448_v57, %v443_v51 }
  0x54   : > { %v878_v58 = vpop.eup %877  ;;  %v483_v60 = vrot.slane %v479_v50, 3  ;;  %v363_v7 = vmul.f32 %v357_v44, %v1264_v22  ;;  %v465_v22 = vsel %vm393_vm5, %v397_v18, %v464_v32  ;;  %v463_v11 = vadd.f32 %v456_v17, %v1270_v24 }
  0x55   : > { %v497_v55 = vrot.slane %v477_v47, 3  ;;  %v421_v63 = vadd.f32 %v878_v58, %v876_v49  ;;  %v423_v2 = vmul.f32 0.14285715, %v878_v58  ;;  %v432_v9 = vmul.f32 %v426_v54, %v1292_v53 }
  0x56   : > { %v358_v10 = vrot.slane %v354_v56, 3  ;;  %v489_v12 = vmul.f32 %v483_v60, %v468_v59  ;;  %v462_v26 = vadd.f32 %v458_v61, %v455_v13  ;;  %v470_v42 = vadd.f32 %v465_v22, %v463_v11 }
  0x57   : > { %881 = vrcp.f32 %v497_v55  ;;  %v880_v4 = vpop.eup %879  ;;  %v427_v14 = vrot.slane %v423_v2, 3  ;;  %v435_v23 = vadd.f32 %v432_v9, %v363_v7  ;;  %vm508_vm7 = vweird.f32 %v497_v55 }
  0x58   : > { %v478_v15 = vadd.f32 %v880_v4, %v421_v63  ;;  %v480_v16 = vmul.f32 0.09090909, %v880_v4  ;;  %v359_v25 = vsel %vm309_vm0, %v357_v44, %v358_v10  ;;  %v514_v30 = vand.u32 2147483648, %v497_v55 }
  0x59   : > { %v428_v20 = vsel %vm309_vm0, %v426_v54, %v427_v14  ;;  %v512_v33 = vand.u32 2147483647, %v497_v55  ;;  %v364_v39 = vmul.f32 %v359_v25, %v1299_v62  ;;  %v469_v35 = vadd.f32 %v462_v26, %v1321_v27 }
  0x5a   : > { %v1339_v19 = vrot.slane %v478_v15, 3  ;;  %v484_v28 = vrot.slane %v480_v16, 3  ;;  %v433_v18 = vmul.f32 %v428_v20, %v412_v38  ;;  %v515_v40 = vor.u32 1.1754944e-38, %v514_v30 }
  0x5b   : > { %v365_v24 = vmul.f32 %v358_v10, %v1302_v8  ;;  %v434_v41 = vmul.f32 %v427_v14, %v413_v48  ;;  %v492_v43 = vadd.f32 %v489_v12, %v435_v23  ;;  %vm513_vm10 = vcmp.eq.f32.partialorder %v512_v33, 8.507059e+37 }
  0x5c   : > { %v499_v29 = vsel %vm309_vm0, %v497_v55, %v1339_v19  ;;  %v485_v36 = vsel %vm309_vm0, %v483_v60, %v484_v28  ;;  %v436_v62 = vadd.f32 %v433_v18, %v364_v39  ;;  %v491_v48 = vmul.f32 %v484_v28, %v470_v42 }
  0x5d   : > { %v882_v21 = vpop.eup %881  ;;  %883 = vrcp.f32 %v499_v29  ;;  %v490_v38 = vmul.f32 %v485_v36, %v469_v35  ;;  %vm523_vm11 = vweird.f32 %v499_v29  ;;  %v527_v49 = vand.u32 2147483647, %v499_v29 }
  0x5e   : > { %v504_v53 = vmul.f32 %v882_v21, %v497_v55  ;;  %vm509_vm8 = vweird.f32 %v882_v21  ;;  %885 = vrcp.f32 %v1339_v19  ;;  %v529_v44 = vand.u32 2147483648, %v499_v29 }
  0x5f   : > { %vm1353_vm9 = vmor %vm508_vm7, %vm509_vm8  ;;  %v437_v8 = vadd.f32 %v434_v41, %v365_v24  ;;  %v544_v55 = vand.u32 2147483648, %v1339_v19  ;;  %vm538_vm13 = vweird.f32 %v1339_v19  ;;  %v542_v57 = vand.u32 2147483647, %v1339_v19 }
  0x60   : > { %v505_v31 = vsub.f32 1.0, %v504_v53  ;;  %v530_v6 = vor.u32 1.1754944e-38, %v529_v44  ;;  %v493_v60 = vadd.f32 %v490_v38, %v436_v62  ;;  %vm528_vm0 = vcmp.eq.f32.partialorder %v527_v49, 8.507059e+37 }
  0x61   : > { %v545_v2 = vor.u32 1.1754944e-38, %v544_v55  ;;  %v494_v3 = vadd.f32 %v491_v48, %v437_v8  ;;  %vm543_vm2 = vcmp.eq.f32.partialorder %v542_v57, 8.507059e+37 }
  0x62   : > { %v506_v5 = vmul.f32 %v882_v21, %v505_v31 }
  0x63   : > { %v884_v45 = vpop.eup %883 }
  0x64   : > { %v507_v34 = vadd.f32 %v882_v21, %v506_v5  ;;  %v886_v27 = vpop.eup %885  ;;  %v519_v47 = vmul.f32 %v884_v45, %v499_v29  ;;  %vm524_vm12 = vweird.f32 %v884_v45 }
  0x65   : > { %v534_v51 = vmul.f32 %v886_v27, %v1339_v19  ;;  %vm539_vm14 = vweird.f32 %v886_v27  ;;  %vm1367_vm15 = vmor %vm523_vm11, %vm524_vm12 }
  0x66   : > { %v511_v46 = vsel %vm1353_vm9, %v882_v21, %v507_v34  ;;  %v520_v54 = vsub.f32 1.0, %v519_v47  ;;  %vm540_vm1 = vmor %vm538_vm13, %vm539_vm14 }
  0x67   : > { %v516_v50 = vsel %vm513_vm10, %v515_v40, %v511_v46  ;;  %v535_v56 = vsub.f32 1.0, %v534_v51 }
  0x68   : > { %v517_v52 = vmul.f32 %v516_v50, %v492_v43  ;;  %v521_v58 = vmul.f32 %v884_v45, %v520_v54 }
  0x69   : > { %v536_v32 = vmul.f32 %v886_v27, %v535_v56 }
  0x6a   : > { %548 = vst [vmem:[%s274_s29 - $0x5] sm:$0xe0] %v517_v52  ;;  %v522_v63 = vadd.f32 %v884_v45, %v521_v58  ;;  %v554_v13 = vrot.slane %v517_v52, 5 }
  0x6b   : > { %v537_v4 = vadd.f32 %v886_v27, %v536_v32 }
  0x6c   : > { %v526_v7 = vsel %vm1367_vm15, %v884_v45, %v522_v63 }
  0x6d   : > { %v531_v9 = vsel %vm528_vm0, %v530_v6, %v526_v7  ;;  %v541_v10 = vsel %vm540_vm1, %v886_v27, %v537_v4 }
  0x6e   : > { %v532_v14 = vmul.f32 %v531_v9, %v493_v60  ;;  %v546_v61 = vsel %vm543_vm2, %v545_v2, %v541_v10 }
  0x6f   : > { %v547_v15 = vmul.f32 %v546_v61, %v494_v3 }
  0x70   : > { %549 = vst [vmem:[%s274_s29 + $0x3] sm:$0xff] %v532_v14  ;;  %v555_v16 = vrot.slane %v532_v14, 5 }
  0x71   : > { %550 = vst [vmem:[%s274_s29 + $0xb] sm:$0x1f] %v547_v15  ;;  %v557_v17 = vrot.slane %v547_v15, 5 }
  0x72   : > { %v556_v12 = vsel %vm393_vm5, %v554_v13, %v555_v16 }
  0x73   : > { %974 = shalt.err (!%p971_p1)
}
  0x74   : > { %s1075_s0 = smov 128   ;;  %s1076_s18 = smov 8   ;;  %v561_v19 = vsub.f32 %v1225_v0, %v556_v12  ;;  %v558_v21 = vsel %vm393_vm5, %v555_v16, %v557_v17 }
  0x75   : > { %788 = dma.vmem_to_hbm [thread:$0]  (%p1154_p8), %s1374_s30, 256, %s605_s5, %s571_s14, %s1075_s0, %s1075_s0, %s1076_s18   ;;  %v562_v23 = vsub.f32 %v1227_v1, %v558_v21 }
  0x76   : > { %563 = vst [vmem:[%s267_s6] sm:$0xff] %v561_v19  ;;  %s566_s11 = scalar_lea.sflag [#allocation4], %s1214_s23  ;;  %s989_s12 = sshra.s32 %s587_s10, 4  ;;  %s990_s12 = int_to_ptr.hbm [resolvable:$true] %s989_s12 }
  0x77   : > { %564 = vst [vmem:[%s267_s6 + $0x8] sm:$0xff] %v562_v23  ;;  %s991_s1 = scalar_lea.hbm %s990_s12, 16  ;;  %s995_s5 = scalar_lea.hbm %s1438_s3, 32 }
  0x78   : > { %p992_p2 = scmp.ne.s32.totalorder %s990_s12, %s991_s1  ;;  %p996_p5 = scmp.lt.s32.totalorder %s990_s12, %s1438_s3 }
  0x79   : > { %p997_p3 = scmp.lt.s32.totalorder %s995_s5, %s991_s1 }
  0x7a   : > { %p993_p4 = pnand %p992_p2, %p1154_p8 }
  0x7b   : > { %p998_p7 = por %p997_p3, %p996_p5 }
  0x7c   : > { %p994_p6 = pneg %p993_p4 }
  0x7e   : > { %p999_p10 = pnand %p998_p7, %p994_p6 }
  0x80   : > { %1002 = shalt.err (!%p999_p10)
}
  0x81   : > { %787 = dma.vmem_to_hbm [thread:$0]  (%p1154_p8), %s585_s24, 256, %s587_s10, %s566_s11, %s1075_s0, %s1075_s0, %s1076_s18  }
  0x82 PF: > { %s619_s23 = sand.u32 1, %s1049_s15   ;;  %p803_p11 = pnand %p752_p13, %p1158_p9 }
  0x83   : > { %s620_s6 = scalar_lea.sflag [#allocation4], %s619_s23 }
  0x84   : > { %p804_p12 = pneg %p803_p11 }
  0x86   : > { %1040 = dma.done.wait (%p804_p12), %s620_s6, 256  }
  0x87   : > { %1042 = vsyncadd (%p804_p12), %s620_s6, 4294967040  ;;  %s630_s22 = scalar_lea.sflag [#allocation11], %s619_s23 }
  0x88   : > { %1044 = dma.done.wait (%p804_p12), %s630_s22, 256  }
  0x89   : > { %1046 = vsyncadd (%p804_p12), %s630_s22, 4294967040  ;;  %s26_s20 = sadd.s32 1, %s1069_s20   ;;  %s1455_s15 = smov %s1053_s16 }
  0x8a   : > { %p23_p0 = scmp.ge.s32.totalorder %s26_s20, 4   ;;  %s1456_s16 = smov %s1057_s17 }
  0x8b   : > { %s1457_s17 = smov %s1199_s9  ;;  %s1458_s18 = smov %s1065_s19 }
  0x8c   : > { %s1459_s19 = smov %s1461_s13  ;;  %25 = sbr.rel (!%p23_p0) target bundleno = 13 (0xd), region = 103 }
  0x91   :  { %636 = vsyncpa [#allocation3], 1 }
  0x92   :  { %638 = vsyncpa [#allocation3 + $0x1], 1 }
  0x93   :  { %639 = vsyncpa [#allocation4], 1 }
  0x94   :  { %641 = vsyncpa [#allocation4 + $0x1], 1 }
  0x95   :  { %642 = vsyncpa [#allocation11], 1 }
  0x96   :  { %644 = vsyncpa [#allocation11 + $0x1], 1 }
  0x97   :  { %645 = vsyncpa [#allocation5], 1 }
  0x98   :  { %647 = vsyncpa [#allocation5 + $0x1], 1 }
  0x99   :  { %648 = vsyncpa [#allocation7], 1 }

</bundles_post_ra>
